<compile_context>
chip_gen: v7x
topology: tpu7x:2x2x1
jax: 0.10.0
libtpu: 0.0.40
codegen_flags: <defaults>
</compile_context>

<pallas_src>
import functools
import math

import jax
import jax.numpy as jnp
from jax import lax
from jax.experimental import pallas as pl
from jax.experimental.pallas import tpu as pltpu


def _norm_softmax_loss_kernel(x_ref, w_ref, t_ref, loss_ref, *,
                              inv_temperature, mxu_dtype):
    x = x_ref[...].astype(jnp.float32)          # [B, dim]
    w = w_ref[...].astype(jnp.float32)          # [n_class, dim]
    t = t_ref[...]                              # [B, 1] int32

    # F.normalize default eps=1e-12:  v / max(||v||, eps).
    # 1 / max(||v||, eps) == min(rsqrt(sum v^2), 1/eps)  -> one EUP op per row.
    inv_eps = jnp.float32(1e12)
    x_sumsq = jnp.sum(x * x, axis=-1, keepdims=True)           # [B, 1]
    w_sumsq = jnp.sum(w * w, axis=-1, keepdims=True)           # [n_class, 1]
    x_scale = jnp.minimum(lax.rsqrt(x_sumsq), inv_eps) * jnp.float32(inv_temperature)
    w_scale = jnp.minimum(lax.rsqrt(w_sumsq), inv_eps)

    # Fold 1/temperature into the x normalization multiply; cast MXU operands
    # (bf16 at production sizes, f32 here for exact parity), f32 accumulation.
    xn = (x * x_scale).astype(mxu_dtype)                        # [B, dim]
    wn = (w * w_scale).astype(mxu_dtype)                        # [n_class, dim]

    # logits / T = (x/|x|) @ (w/|w|).T / T, contraction on the last dim of
    # both operands — no materialized transpose of the weight tile.
    logits = lax.dot_general(
        xn, wn,
        dimension_numbers=(((1,), (1,)), ((), ())),
        preferred_element_type=jnp.float32)                     # [B, n_class]

    # Cross entropy (mean reduction) on shifted logits only:
    #   loss_i = log(sum(exp(shifted_i))) - shifted_i[t_i]   (row_max cancels)
    row_max = jnp.max(logits, axis=-1, keepdims=True)           # [B, 1]
    shifted = logits - row_max                                  # [B, n_class]

    b, n_class = shifted.shape
    col_ids = lax.broadcasted_iota(jnp.int32, (b, n_class), 1)
    onehot = col_ids == t                                       # t broadcasts [B,1]
    picked = jnp.sum(jnp.where(onehot, shifted, 0.0), axis=-1, keepdims=True)

    lse = jnp.log(jnp.sum(jnp.exp(shifted), axis=-1, keepdims=True))  # [B, 1]
    per_example = lse - picked                                  # [B, 1]

    # Scalar result: 1-D f32[1] in SMEM.
    loss_ref[0] = jnp.sum(per_example) * jnp.float32(1.0 / b)


def norm_softmax_loss(x, weight, t, temperature=0.05, mxu_dtype=jnp.float32):
    """x: [B, dim] float, weight: [n_class, dim] float, t: [B] int -> scalar f32.

    mxu_dtype: dtype of the MXU operands. jnp.float32 gives exact parity with
    the f32 PyTorch module; use jnp.bfloat16 at production dim/n_class for
    single-pass MXU throughput (f32 accumulation is preserved).
    """
    b, dim = x.shape
    n_class, _ = weight.shape
    t2 = t.astype(jnp.int32).reshape(b, 1)

    kernel = functools.partial(
        _norm_softmax_loss_kernel,
        inv_temperature=1.0 / temperature,
        mxu_dtype=mxu_dtype)

    loss = pl.pallas_call(
        kernel,
        out_shape=jax.ShapeDtypeStruct((1,), jnp.float32),
        in_specs=[
            pl.BlockSpec((b, dim), lambda: (0, 0)),
            pl.BlockSpec((n_class, dim), lambda: (0, 0)),
            pl.BlockSpec((b, 1), lambda: (0, 0)),
        ],
        out_specs=pl.BlockSpec(memory_space=pltpu.MemorySpace.SMEM),
    )(x, weight, t2)
    return loss[0]


if __name__ == "__main__":
    # Module config (small, consistent with forward): dim=32, n_class=16, batch=8.
    dim = 32
    n_class = 16
    batch = 8
    temperature = 0.05

    key = jax.random.PRNGKey(0)
    kx, kw, kt = jax.random.split(key, 3)

    # Deterministic parameter init, mirroring uniform_(-stdv, stdv).
    stdv = 1.0 / math.sqrt(dim)
    weight = jax.random.uniform(kw, (n_class, dim), jnp.float32,
                                minval=-stdv, maxval=stdv)

    x = jax.random.normal(kx, (batch, dim), jnp.float32)
    t = jax.random.randint(kt, (batch,), 0, n_class, dtype=jnp.int32)

    loss = norm_softmax_loss(x, weight, t, temperature=temperature)
    jax.block_until_ready(loss)

    # Pure-JAX reference check. With the exact rsqrt normalization and f32 MXU
    # operands the kernel matches the f32 reference to ~1e-6; tolerance kept
    # conservative.
    def ref(x, w, t):
        xn = x / jnp.maximum(jnp.linalg.norm(x, axis=-1, keepdims=True), 1e-12)
        wn = w / jnp.maximum(jnp.linalg.norm(w, axis=-1, keepdims=True), 1e-12)
        logits = (xn @ wn.T) / temperature
        lse = jax.nn.logsumexp(logits, axis=-1)
        picked = jnp.take_along_axis(logits, t[:, None], axis=-1)[:, 0]
        return jnp.mean(lse - picked)

    ref_loss = ref(x, weight, t)
    assert jnp.allclose(loss, ref_loss, atol=1e-4, rtol=1e-5), (loss, ref_loss)

    print("KERNEL_OK")
</pallas_src>

<mosaic_0001>
module attributes {stable_mosaic.version = 11 : i64} {
  func.func @_norm_softmax_loss_kernel(%arg0: memref<8x32xf32, #tpu.memory_space<vmem>>, %arg1: memref<16x32xf32, #tpu.memory_space<vmem>>, %arg2: memref<8x1xi32, #tpu.memory_space<vmem>>, %arg3: memref<1xf32, #tpu.memory_space<smem>>) attributes {dimension_semantics = [], scalar_prefetch = 0 : i64, scratch_operands = 0 : i64, tpu.core_type = #tpu.core_type<tc>} {
    %c0 = arith.constant 0 : index
    %c0_0 = arith.constant 0 : index
    %0 = vector.load %arg0[%c0, %c0_0] : memref<8x32xf32, #tpu.memory_space<vmem>>, vector<8x32xf32>
    %c0_1 = arith.constant 0 : index
    %c0_2 = arith.constant 0 : index
    %1 = vector.load %arg1[%c0_1, %c0_2] : memref<16x32xf32, #tpu.memory_space<vmem>>, vector<16x32xf32>
    %c0_3 = arith.constant 0 : index
    %c0_4 = arith.constant 0 : index
    %2 = vector.load %arg2[%c0_3, %c0_4] : memref<8x1xi32, #tpu.memory_space<vmem>>, vector<8x1xi32>
    %3 = arith.mulf %0, %0 : vector<8x32xf32>
    %cst = arith.constant dense<0.000000e+00> : vector<8xf32>
    %4 = vector.multi_reduction <add>, %3, %cst [1] : vector<8x32xf32> to vector<8xf32>
    %5 = vector.shape_cast %4 : vector<8xf32> to vector<8x1xf32>
    %6 = arith.mulf %1, %1 : vector<16x32xf32>
    %cst_5 = arith.constant dense<0.000000e+00> : vector<16xf32>
    %7 = vector.multi_reduction <add>, %6, %cst_5 [1] : vector<16x32xf32> to vector<16xf32>
    %8 = vector.shape_cast %7 : vector<16xf32> to vector<16x1xf32>
    %9 = math.rsqrt %5 : vector<8x1xf32>
    %cst_6 = arith.constant 9.99999995E+11 : f32
    %10 = vector.broadcast %cst_6 : f32 to vector<8x1xf32>
    %11 = arith.minimumf %9, %10 : vector<8x1xf32>
    %cst_7 = arith.constant 2.000000e+01 : f32
    %12 = vector.broadcast %cst_7 : f32 to vector<8x1xf32>
    %13 = arith.mulf %11, %12 : vector<8x1xf32>
    %14 = math.rsqrt %8 : vector<16x1xf32>
    %cst_8 = arith.constant 9.99999995E+11 : f32
    %15 = vector.broadcast %cst_8 : f32 to vector<16x1xf32>
    %16 = arith.minimumf %14, %15 : vector<16x1xf32>
    %17 = vector.broadcast %13 : vector<8x1xf32> to vector<8x32xf32>
    %18 = arith.mulf %0, %17 : vector<8x32xf32>
    %19 = vector.broadcast %16 : vector<16x1xf32> to vector<16x32xf32>
    %20 = arith.mulf %1, %19 : vector<16x32xf32>
    %cst_9 = arith.constant dense<0.000000e+00> : vector<8x16xf32>
    %21 = tpu.matmul %18, %20, %cst_9 {dimension_numbers = #tpu.dot_dimension_numbers<[1], [1], [0], [0], [0, 0, 1, 0], [], []>} : vector<8x32xf32>, vector<16x32xf32>, vector<8x16xf32> -> vector<8x16xf32>
    %cst_10 = arith.constant dense<0xFF800000> : vector<8xf32>
    %22 = vector.multi_reduction <maximumf>, %21, %cst_10 [1] : vector<8x16xf32> to vector<8xf32>
    %23 = vector.shape_cast %22 : vector<8xf32> to vector<8x1xf32>
    %24 = vector.broadcast %23 : vector<8x1xf32> to vector<8x16xf32>
    %25 = arith.subf %21, %24 : vector<8x16xf32>
    %26 = tpu.iota {dimensions = array<i32: 1>} : vector<8x16xi32>
    %27 = vector.broadcast %2 : vector<8x1xi32> to vector<8x16xi32>
    %28 = arith.cmpi eq, %26, %27 : vector<8x16xi32>
    %cst_11 = arith.constant 0.000000e+00 : f32
    %29 = vector.broadcast %cst_11 : f32 to vector<8x16xf32>
    %30 = arith.select %28, %25, %29 : vector<8x16xi1>, vector<8x16xf32>
    %cst_12 = arith.constant dense<0.000000e+00> : vector<8xf32>
    %31 = vector.multi_reduction <add>, %30, %cst_12 [1] : vector<8x16xf32> to vector<8xf32>
    %32 = vector.shape_cast %31 : vector<8xf32> to vector<8x1xf32>
    %33 = math.exp %25 : vector<8x16xf32>
    %cst_13 = arith.constant dense<0.000000e+00> : vector<8xf32>
    %34 = vector.multi_reduction <add>, %33, %cst_13 [1] : vector<8x16xf32> to vector<8xf32>
    %35 = vector.shape_cast %34 : vector<8xf32> to vector<8x1xf32>
    %36 = math.log %35 : vector<8x1xf32>
    %37 = arith.subf %36, %32 : vector<8x1xf32>
    %38 = vector.shape_cast %37 : vector<8x1xf32> to vector<1x8x1xf32>
    %cst_14 = arith.constant dense<0.000000e+00> : vector<1xf32>
    %39 = vector.multi_reduction <add>, %38, %cst_14 [1, 2] : vector<1x8x1xf32> to vector<1xf32>
    %40 = vector.shape_cast %39 : vector<1xf32> to vector<1x1x1xf32>
    %41 = vector.extract %40[0, 0, 0] : f32 from vector<1x1x1xf32>
    %cst_15 = arith.constant 1.250000e-01 : f32
    %42 = arith.mulf %41, %cst_15 : f32
    %c0_16 = arith.constant 0 : index
    %43 = memref.load %arg3[%c0_16] : memref<1xf32, #tpu.memory_space<smem>>
    memref.store %42, %arg3[%c0_16] : memref<1xf32, #tpu.memory_space<smem>>
    return
  }
}

</mosaic_0001>

<bundles_post_ra>
// kernel: tpu_custom_call.1
= control target key start
LH: loop header
LB: loop body
LE: loop exit
PB: predicated region body
PF: predicated region fallthrough
CT: control target
= control target key end

     0   :  { %8 = vsyncpa [#allocation3], 0  ;;  %s327_s0 = inlined_call_operand.vmem [shape: f32[8,32], index: 0, kind: input, shape index: {}]   ;;  %s328_s1 = inlined_call_operand.hbm [shape: f32[16,32], index: 1, kind: input, shape index: {}]   ;;  %s329_s2 = inlined_call_operand.vmem [shape: s32[8,1], index: 2, kind: input, shape index: {}]   ;;  %s330_s3 = inlined_call_operand.hbm [shape: f32[1], index: 3, kind: output, shape index: {}]  }
   0x1   :  { %9 = vsyncpa [#allocation4], 0  ;;  %s260_s12 = smov [#allocation2]   ;;  %s224_s16 = scalar_lea.hbm %s328_s1, 256 }
   0x2   :  { %s17_s13 = sshll.u32 %s260_s12, 4  ;;  %p225_p0 = scmp.ne.s32.totalorder %s328_s1, %s224_s16  ;;  %s18_s13 = int_to_ptr.vmem [resolvable:$true] %s17_s13 }
   0x3   :  { %p228_p1 = scmp.lt.u32.totalorder %s224_s16, %s328_s1 }
   0x5   :  { %p230_p2 = pnand %p228_p1, %p225_p0 }
   0x7   :  { %233 = shalt.err (!%p230_p2)
}
   0x8   :  { %s234_s21 = scalar_lea.vmem %s18_s13, 256  ;;  %p239_p4 = scmp.lt.s32.totalorder %s18_s13, %s18_s13 }
   0x9   :  { %p235_p3 = scmp.ne.s32.totalorder %s18_s13, %s234_s21  ;;  %p240_p5 = scmp.lt.s32.totalorder %s234_s21, %s234_s21 }
   0xb   :  { %p241_p6 = por %p240_p5, %p239_p4 }
   0xd   :  { %p242_p7 = pnand %p241_p6, %p235_p3 }
   0xf   :  { %245 = shalt.err (!%p242_p7)
}
  0x10   :  { %s261_s22 = smov 128   ;;  %s262_s23 = smov 8  }
  0x11   :  { %23 = dma.hbm_to_vmem [thread:$0]  %s328_s1, 256, %s18_s13, [#allocation3], %s261_s22, %s261_s22, %s262_s23  }
  0x12   :  { %256 = dma.done.wait [#allocation3], 256  }
  0x13   :  { %257 = vsyncadd [#allocation3], 4294967040  ;;  %v30_v0 = vld [vmem:[#allocation2] sm:$0xff]  ;;  %vm34_vm0 = vcmask 261120   ;;  %v31_v1 = vld [vmem:[#allocation2 + $0x8] sm:$0xff]  ;;  %v263_v9 = vmov 0.0|0.0   ;;  %v140_v33 = vlaneseq }
  0x14   :  { %v29_v2 = vld [vmem:[%s327_s0] sm:$0xff]  ;;  %v38_v3 = vmul.f32 %v30_v0, %v30_v0  ;;  %v39_v4 = vmul.f32 %v31_v1, %v31_v1  ;;  %199 = vmatprep.subr.bf16.mxu0 %v263_v9  ;;  %vm264_vm1 = vmmov 0   ;;  %v265_v10 = vmov 0.0   ;;  %vm201_vm2 = vmpackc.low %vm34_vm0, %vm34_vm0  ;;  %s246_s4 = scalar_lea.hbm %s330_s3, 16 }
  0x15   :  { %v33_v5 = vmul.f32 %v29_v2, %v29_v2  ;;  %196 = vmatprep.mubr.msk.f32.mxu0 %vm264_vm1, %v265_v10  ;;  %v32_v25 = vld [vmem:[%s329_s2] sm:$0xff]  ;;  %v266_v26 = vmov 0   ;;  %vm135_vm3 = vcmask 130048   ;;  %v141_v34 = vand.u32 127, %v140_v33  ;;  %p247_p8 = scmp.ne.s32.totalorder %s330_s3, %s246_s4  ;;  %p250_p9 = scmp.lt.u32.totalorder %s246_s4, %s330_s3 }
  0x16   :  { %v40_v6 = vsel %vm34_vm0, %v38_v3, 0.0  ;;  %v43_v8 = vsel %vm34_vm0, %v39_v4, 0.0  ;;  %213 = vset.pattern.permute.xlu0 %v266_v26  ;;  %vm158_vm5 = vcmask 7168  }
  0x17   :  { %v35_v7 = vsel %vm34_vm0, %v33_v5, 0.0  ;;  %41 = vadd.xlane.f32.xlu0 %v40_v6  ;;  %p252_p10 = pnand %p250_p9, %p247_p8 }
  0x18   :  { %36 = vadd.xlane.f32.xlu1 %v35_v7 }
  0x1b   :  { %44 = vadd.xlane.f32.xlu0 %v43_v8 }
  0x31   :  { %143 = vperm.xlu0 %213, %v32_v25  }
  0xa4   :  { %v42_v11 = vpop.xlane.xlu0 %41 }
  0xa5   :  { %214 = vrsqrt.f32 %v42_v11  ;;  %v37_v12 = vpop.xlane.xlu1 %36 }
  0xa6   :  { %216 = vrsqrt.f32 %v37_v12 }
  0xa8   :  { %v45_v13 = vpop.xlane.xlu0 %44 }
  0xa9   :  { %218 = vrsqrt.f32 %v45_v13 }
  0xaf   :  { %v215_v14 = vpop.eup %214 }
  0xb0   :  { %v217_v15 = vpop.eup %216  ;;  %v51_v16 = vmin.f32 %v215_v14, 1e+12  ;;  %v144_v35 = vpop.permute.xlu0 %143 }
  0xb1   :  { %v47_v19 = vmin.f32 %v217_v15, 1e+12  ;;  %vm145_vm4 = vcmp.eq.s32.totalorder %v141_v34, %v144_v35 }
  0xb2   :  { %v54_v20 = vmul.f32 %v51_v16, %v30_v0 }
  0xb3   :  { %v219_v17 = vpop.eup %218  ;;  %v48_v23 = vmul.f32 20.0, %v47_v19 }
  0xb4   :  { %v52_v18 = vmin.f32 %v219_v17, 1e+12 }
  0xb5   :  { %v53_v24 = vmul.f32 %v48_v23, %v29_v2 }
  0xb6   :  { %v55_v21 = vmul.f32 %v52_v18, %v31_v1 }
  0xb8   :  { %v200_v22 = vpack.c.bf16 %v55_v21, %v54_v20 }
  0xba   :  { %202 = vmatpush3.bf16.xpose.msk.msra.mxu0 %vm201_vm2, %v200_v22 }
  0xc1   :  { %197 = vmatmul.mubr.msk.f32.vlgmr.msra.gmra.mrb[0].mxu0 %vm34_vm0, %v53_v24 }
 0x194   :  { %v131_v27 = vpop.f32.mrb[0].mxu0 }
 0x195   :  { %v198_v28 = vpop.f32.mrb[1].mxu0  ;;  %v136_v29 = vsel %vm135_vm3, %v131_v27, -inf }
 0x196   :  { %137 = vmax.xlane.f32.xlu1 %v136_v29 }
 0x223   :  { %v138_v30 = vpop.xlane.xlu1 %137 }
 0x224   :  { %v139_v31 = vsub.f32 %v131_v27, %v138_v30 }
 0x226   :  { %v150_v32 = vmul.f32 1.442695, %v139_v31  ;;  %v146_v38 = vsel %vm145_vm4, %v139_v31, 0.0 }
 0x227   :  { %v147_v39 = vsel %vm135_vm3, %v146_v38, 0.0 }
 0x228   :  { %220 = vpow2.f32 %v150_v32 }
 0x232   :  { %v221_v36 = vpop.eup %220 }
 0x233   :  { %v152_v37 = vsel %vm135_vm3, %v221_v36, 0.0 }
 0x234   :  { %153 = vadd.xlane.f32.xlu1 %v152_v37 }
 0x238   :  { %148 = vadd.xlane.f32.xlu1 %v147_v39 }
 0x2c1   :  { %v154_v40 = vpop.xlane.xlu1 %153 }
 0x2c2   :  { %222 = vlog2.f32 %v154_v40 }
 0x2c5   :  { %v149_v43 = vpop.xlane.xlu1 %148 }
 0x2cc   :  { %v223_v41 = vpop.eup %222 }
 0x2cd   :  { %v156_v42 = vmul.f32 0.6931472, %v223_v41 }
 0x2cf   :  { %v157_v44 = vsub.f32 %v156_v42, %v149_v43 }
 0x2d1   :  { %v159_v45 = vsel %vm158_vm5, %v157_v44, 0.0 }
 0x2d2   :  { %160 = vadd.xlane.f32.xlu1 %v159_v45 }
 0x35f   :  { %v161_v46 = vpop.xlane.xlu1 %160 }
 0x360   :  { %v162_v47 = vrot.slane %v161_v46, 4 }
 0x362   :  { %v163_v48 = vadd.f32 %v162_v47, %v161_v46 }
 0x364   :  { %v164_v49 = vrot.slane %v163_v48, 2 }
 0x366   :  { %v165_v50 = vadd.f32 %v164_v49, %v163_v48 }
 0x368   :  { %v166_v51 = vrot.slane %v165_v50, 1 }
 0x36a   :  { %v167_v52 = vadd.f32 %v166_v51, %v165_v50 }
 0x36c   :  { %203 = vpush %v167_v52 }
 0x39d   :  { %s204_s2 = spop %203 }
 0x39e   :  { %s169_s28 = smul.f32 0.125, %s204_s2 }
 0x3a0   :  { %171 = sst [smem:[#allocation5]] %s169_s28 }
 0x3a1   :  { %255 = shalt.err (!%p252_p10)
}
 0x3a2   :  { %s267_s9 = smov [#allocation5]  }
 0x3a3   :  { %179 = dma.smem_to_hbm %s267_s9, 16, %s330_s3, [#allocation4]  }
 0x3a4   :  { %258 = dma.done.wait [#allocation4], 16  }
 0x3a5   :  { %259 = vsyncadd [#allocation4], 4294967280 }
 0x3a6   :  { %183 = sfence }
 0x3a7   :  { %184 = vsyncpa [#allocation3], 1 }
 0x3a8   :  { %185 = vsyncpa [#allocation4], 1 }

</bundles_post_ra>
